<compile_context>
chip_gen: v6e
topology: v6e:2x2x1
jax: 0.10.0
libtpu: 0.0.40
codegen_flags: <defaults>
</compile_context>

<pallas_src>
import jax
import jax.numpy as jnp
from jax.experimental import pallas as pl
from jax.experimental.pallas import tpu as pltpu

QA_LANE_PAD = 128  # pad the 2-wide QA projection to one full lane group (lane-dense store)


def _pick_m_tile(m: int, target: int = 128) -> int:
    """Largest multiple of 8 that divides m, capped at `target` (fallback: m itself).
    `target` can be raised to 256/512 on v6e/v7x for more DMA amortization."""
    t = min(target, m)
    t -= t % 8
    while t >= 8:
        if m % t == 0:
            return t
        t -= 8
    return m


# ---------------------------------------------------------------------------
# Fused kernel: synthetic encoder layers + QA-head projection for one row tile.
# ---------------------------------------------------------------------------
def _encoder_qa_kernel(x_ref, lw_ref, qw_ref, qb_ref, logits_ref):
    """
    x_ref      : [tm, H]            bf16  (word+segment embeddings, pipelined per tile)
    lw_ref     : [L, H, H]          bf16  (all layer weights, VMEM-resident)
    qw_ref     : [H, QA_LANE_PAD]   bf16  (QA projection, zero-padded past column 2)
    qb_ref     : [1, QA_LANE_PAD]   f32   (QA bias, zero-padded past column 2)
    logits_ref : [tm, QA_LANE_PAD]  f32
    """
    x = x_ref[...]                                              # bf16 [tm, H]
    n_layers = lw_ref.shape[0]
    for l in range(n_layers):                                   # static unroll (L is small)
        acc = jnp.dot(x, lw_ref[l],                             # MXU: bf16 in,
                      preferred_element_type=jnp.float32)       #      f32 accumulate
        x = jnp.tanh(acc).astype(jnp.bfloat16)                  # EUP tanh in f32, bf16 carry
    qa = jnp.dot(x, qw_ref[...],                                # [tm, QA_LANE_PAD] f32
                 preferred_element_type=jnp.float32)
    logits_ref[...] = qa + qb_ref[...]                          # lane-dense f32 store


def encoder_qa_logits(x_flat, layer_w, qa_w_pad, qa_b_pad, *, m_tile_target=128):
    """Run the fused encoder+QA-head kernel. x_flat: [M, H] bf16 -> [M, QA_LANE_PAD] f32."""
    m, h = x_flat.shape
    n_layers = layer_w.shape[0]
    tm = _pick_m_tile(m, m_tile_target)
    grid = (m // tm,)

    cost = pl.CostEstimate(
        flops=2 * m * h * (h * n_layers + QA_LANE_PAD),
        transcendentals=m * h * n_layers,
        bytes_accessed=(m * h * 2 + n_layers * h * h * 2 + h * QA_LANE_PAD * 2
                        + QA_LANE_PAD * 4 + m * QA_LANE_PAD * 4),
    )

    return pl.pallas_call(
        _encoder_qa_kernel,
        out_shape=jax.ShapeDtypeStruct((m, QA_LANE_PAD), jnp.float32),
        grid_spec=pltpu.PrefetchScalarGridSpec(
            num_scalar_prefetch=0,
            grid=grid,
            in_specs=[
                pl.BlockSpec((tm, h), lambda i: (i, 0)),              # row tile (pipelined)
                pl.BlockSpec((n_layers, h, h), lambda i: (0, 0, 0)),  # weights resident
                pl.BlockSpec((h, QA_LANE_PAD), lambda i: (0, 0)),     # QA proj resident
                pl.BlockSpec((1, QA_LANE_PAD), lambda i: (0, 0)),     # QA bias resident
            ],
            out_specs=pl.BlockSpec((tm, QA_LANE_PAD), lambda i: (i, 0)),
        ),
        compiler_params=pltpu.CompilerParams(
            dimension_semantics=("parallel",),     # megacore-shard row tiles on v7x
            vmem_limit_bytes=32 * 1024 * 1024,     # generous for these tiles; < v7x 64 MiB
        ),
        cost_estimate=cost,
    )(x_flat, layer_w, qa_w_pad, qa_b_pad)


# ---------------------------------------------------------------------------
# compute_qa_loss (jnp port of the PyTorch version; CrossEntropy, ignore_index=S)
# ---------------------------------------------------------------------------
def compute_qa_loss(logits, start_positions, end_positions):
    start_logits, end_logits = logits[:, 0], logits[:, 1]       # each [B, S]
    if start_positions.ndim > 1:
        start_positions = start_positions.squeeze(-1)
    if end_positions.ndim > 1:
        end_positions = end_positions.squeeze(-1)
    ignored_index = start_logits.shape[1]
    start_positions = jnp.clip(start_positions, 0, ignored_index)
    end_positions = jnp.clip(end_positions, 0, ignored_index)

    def _ce(lg, pos):
        valid = pos != ignored_index
        safe_pos = jnp.where(valid, pos, 0)
        logp = jax.nn.log_softmax(lg.astype(jnp.float32), axis=-1)
        nll = -jnp.take_along_axis(logp, safe_pos[:, None], axis=-1)[:, 0]
        nll = jnp.where(valid, nll, 0.0)
        return nll.sum() / jnp.maximum(valid.sum(), 1)

    return 0.5 * (_ce(start_logits, start_positions) + _ce(end_logits, end_positions))


# ---------------------------------------------------------------------------
# QAModel.forward
# ---------------------------------------------------------------------------
def qa_model_forward(params, batch, compute_loss=False):
    input_ids = batch["input_ids"]
    segment_ids = batch["segment_ids"]
    # TODO(synk): the real injected transformer encoder uses input_mask for attention
    # masking; the synthetic tanh-linear encoder has no attention, so it is unused here.
    _ = batch["input_mask"]

    # --- synthetic encoder.encode(...): embedding front-end stays in XLA (gather) ---
    emb = jnp.take(params["embedding"], input_ids, axis=0)
    emb = emb + jnp.take(params["segment_embedding"], segment_ids, axis=0)
    b, s, h = emb.shape
    m = b * s

    x_flat = emb.reshape(m, h).astype(jnp.bfloat16)
    layer_w = jnp.stack(params["layer_weights"]).astype(jnp.bfloat16)       # [L, H, H]

    qa_w = params["qa_w"].astype(jnp.bfloat16)                              # [H, 2]
    qa_b = params["qa_b"].astype(jnp.float32)                               # [2]
    qa_w_pad = jnp.zeros((h, QA_LANE_PAD), jnp.bfloat16).at[:, :2].set(qa_w)
    qa_b_pad = jnp.zeros((1, QA_LANE_PAD), jnp.float32).at[0, :2].set(qa_b)

    # --- fused Pallas kernel: L encoder layers + QA projection per row tile ---
    logits_pad = encoder_qa_logits(x_flat, layer_w, qa_w_pad, qa_b_pad)     # [M, 128]

    # --- QAHead layout: [B, S, 2] -> permute -> [B, 2, S] (as in jiant heads.QAHead) ---
    logits = logits_pad[:, :2].reshape(b, s, 2).transpose(0, 2, 1)

    if compute_loss:
        loss = compute_qa_loss(logits, batch["start_position"], batch["end_position"])
        return logits, loss
    # TODO(synk): the real model also returns encoder_output.other (per-layer hidden states).
    return logits, None


# ---------------------------------------------------------------------------
# Pure-jnp reference with the same bf16-MXU numerics (for correctness check)
# ---------------------------------------------------------------------------
def reference_forward(params, batch):
    emb = jnp.take(params["embedding"], batch["input_ids"], axis=0)
    emb = emb + jnp.take(params["segment_embedding"], batch["segment_ids"], axis=0)
    b, s, h = emb.shape
    x = emb.reshape(b * s, h).astype(jnp.bfloat16)
    for w in params["layer_weights"]:
        acc = jnp.dot(x, w.astype(jnp.bfloat16), preferred_element_type=jnp.float32)
        x = jnp.tanh(acc).astype(jnp.bfloat16)
    qa = jnp.dot(x, params["qa_w"].astype(jnp.bfloat16),
                 preferred_element_type=jnp.float32) + params["qa_b"][None, :]
    return qa.reshape(b, s, 2).transpose(0, 2, 1)


if __name__ == "__main__":
    B, S, H = 2, 128, 32
    VOCAB, N_LAYERS = 50, 3

    key = jax.random.PRNGKey(0)
    k_emb, k_seg, k_w, k_qw, k_qb, k_ids, k_sp, k_ep = jax.random.split(key, 8)

    params = {
        "embedding": jax.random.normal(k_emb, (VOCAB, H), jnp.float32) * 0.1,
        "segment_embedding": jax.random.normal(k_seg, (2, H), jnp.float32) * 0.1,
        "layer_weights": [
            jax.random.normal(jax.random.fold_in(k_w, i), (H, H), jnp.float32) * 0.2
            for i in range(N_LAYERS)
        ],
        "qa_w": jax.random.normal(k_qw, (H, 2), jnp.float32) * 0.2,
        "qa_b": jax.random.normal(k_qb, (2,), jnp.float32) * 0.1,
    }

    input_ids = jax.random.randint(k_ids, (B, S), 0, VOCAB, dtype=jnp.int32)
    segment_ids = jnp.concatenate(
        [jnp.zeros((B, S // 2), jnp.int32), jnp.ones((B, S - S // 2), jnp.int32)], axis=1)
    lengths = jnp.array([S, S - 37], jnp.int32)           # ragged lengths (interface parity)
    input_mask = (jnp.arange(S)[None, :] < lengths[:, None]).astype(jnp.int32)
    start_position = jax.random.randint(k_sp, (B,), 0, S, dtype=jnp.int32)
    end_position = jax.random.randint(k_ep, (B,), 0, S, dtype=jnp.int32)

    batch = dict(input_ids=input_ids, segment_ids=segment_ids, input_mask=input_mask,
                 start_position=start_position, end_position=end_position)

    logits, loss = qa_model_forward(params, batch, compute_loss=True)
    logits = jax.block_until_ready(logits)
    loss = jax.block_until_ready(loss)

    ref = reference_forward(params, batch)
    assert logits.shape == (B, 2, S), logits.shape
    # Tolerance reflects bf16 MXU operands (f32 accumulation) in both paths.
    assert jnp.allclose(logits, ref, atol=5e-2, rtol=5e-2), \
        f"mismatch vs reference, max abs err = {jnp.max(jnp.abs(logits - ref))}"
    assert bool(jnp.isfinite(loss)), loss

    print("KERNEL_OK")
</pallas_src>

<mosaic_0001>
module attributes {stable_mosaic.version = 11 : i64} {
  func.func @_encoder_qa_kernel(%arg0: i32, %arg1: memref<128x32xbf16, #tpu.memory_space<vmem>>, %arg2: memref<3x32x32xbf16, #tpu.memory_space<vmem>>, %arg3: memref<32x128xbf16, #tpu.memory_space<vmem>>, %arg4: memref<1x128xf32, #tpu.memory_space<vmem>>, %arg5: memref<128x128xf32, #tpu.memory_space<vmem>>) attributes {dimension_semantics = [#tpu.dimension_semantics<parallel>], iteration_bounds = array<i64: 2>, scalar_prefetch = 0 : i64, scratch_operands = 0 : i64, tpu.core_type = #tpu.core_type<tc>, window_params = [{transform_indices = @transform_0, window_bounds = array<i64: 128, 32>}, {pipeline_mode = #tpu.pipeline_mode<synchronous>, transform_indices = @transform_1, window_bounds = array<i64: 3, 32, 32>}, {pipeline_mode = #tpu.pipeline_mode<synchronous>, transform_indices = @transform_2, window_bounds = array<i64: 32, 128>}, {pipeline_mode = #tpu.pipeline_mode<synchronous>, transform_indices = @transform_3, window_bounds = array<i64: 1, 128>}, {transform_indices = @transform_4, window_bounds = array<i64: 128, 128>}]} {
    %c0 = arith.constant 0 : index
    %c0_0 = arith.constant 0 : index
    %0 = vector.load %arg1[%c0, %c0_0] : memref<128x32xbf16, #tpu.memory_space<vmem>>, vector<128x32xbf16>
    %c0_1 = arith.constant 0 : index
    %c0_2 = arith.constant 0 : index
    %c0_3 = arith.constant 0 : index
    %1 = vector.load %arg2[%c0_1, %c0_2, %c0_3] : memref<3x32x32xbf16, #tpu.memory_space<vmem>>, vector<1x32x32xbf16>
    %2 = vector.shape_cast %1 : vector<1x32x32xbf16> to vector<32x32xbf16>
    %cst = arith.constant dense<0.000000e+00> : vector<128x32xf32>
    %3 = tpu.matmul %0, %2, %cst {dimension_numbers = #tpu.dot_dimension_numbers<[1], [0], [0], [1], [0, 0, 1, 1], [], []>} : vector<128x32xbf16>, vector<32x32xbf16>, vector<128x32xf32> -> vector<128x32xf32>
    %4 = math.tanh %3 : vector<128x32xf32>
    %5 = arith.truncf %4 : vector<128x32xf32> to vector<128x32xbf16>
    %c1 = arith.constant 1 : index
    %c0_4 = arith.constant 0 : index
    %c0_5 = arith.constant 0 : index
    %6 = vector.load %arg2[%c1, %c0_4, %c0_5] : memref<3x32x32xbf16, #tpu.memory_space<vmem>>, vector<1x32x32xbf16>
    %7 = vector.shape_cast %6 : vector<1x32x32xbf16> to vector<32x32xbf16>
    %cst_6 = arith.constant dense<0.000000e+00> : vector<128x32xf32>
    %8 = tpu.matmul %5, %7, %cst_6 {dimension_numbers = #tpu.dot_dimension_numbers<[1], [0], [0], [1], [0, 0, 1, 1], [], []>} : vector<128x32xbf16>, vector<32x32xbf16>, vector<128x32xf32> -> vector<128x32xf32>
    %9 = math.tanh %8 : vector<128x32xf32>
    %10 = arith.truncf %9 : vector<128x32xf32> to vector<128x32xbf16>
    %c2 = arith.constant 2 : index
    %c0_7 = arith.constant 0 : index
    %c0_8 = arith.constant 0 : index
    %11 = vector.load %arg2[%c2, %c0_7, %c0_8] : memref<3x32x32xbf16, #tpu.memory_space<vmem>>, vector<1x32x32xbf16>
    %12 = vector.shape_cast %11 : vector<1x32x32xbf16> to vector<32x32xbf16>
    %cst_9 = arith.constant dense<0.000000e+00> : vector<128x32xf32>
    %13 = tpu.matmul %10, %12, %cst_9 {dimension_numbers = #tpu.dot_dimension_numbers<[1], [0], [0], [1], [0, 0, 1, 1], [], []>} : vector<128x32xbf16>, vector<32x32xbf16>, vector<128x32xf32> -> vector<128x32xf32>
    %14 = math.tanh %13 : vector<128x32xf32>
    %15 = arith.truncf %14 : vector<128x32xf32> to vector<128x32xbf16>
    %c0_10 = arith.constant 0 : index
    %c0_11 = arith.constant 0 : index
    %16 = vector.load %arg3[%c0_10, %c0_11] : memref<32x128xbf16, #tpu.memory_space<vmem>>, vector<32x128xbf16>
    %cst_12 = arith.constant dense<0.000000e+00> : vector<128x128xf32>
    %17 = tpu.matmul %15, %16, %cst_12 {dimension_numbers = #tpu.dot_dimension_numbers<[1], [0], [0], [1], [0, 0, 1, 1], [], []>} : vector<128x32xbf16>, vector<32x128xbf16>, vector<128x128xf32> -> vector<128x128xf32>
    %c0_13 = arith.constant 0 : index
    %c0_14 = arith.constant 0 : index
    %18 = vector.load %arg4[%c0_13, %c0_14] : memref<1x128xf32, #tpu.memory_space<vmem>>, vector<1x128xf32>
    %19 = vector.broadcast %18 : vector<1x128xf32> to vector<128x128xf32>
    %20 = arith.addf %17, %19 : vector<128x128xf32>
    %c0_15 = arith.constant 0 : index
    %c0_16 = arith.constant 0 : index
    %21 = vector.load %arg5[%c0_15, %c0_16] : memref<128x128xf32, #tpu.memory_space<vmem>>, vector<128x128xf32>
    tpu.vector_store %arg5[%c0_15, %c0_16], %20 {strides = array<i32>} : memref<128x128xf32, #tpu.memory_space<vmem>>, vector<128x128xf32>,
    return
  }
  func.func @transform_0(%arg0: i32) -> (i32, i32) {
    %c0_i32 = arith.constant 0 : i32
    %c0_i32_0 = arith.constant 0 : i32
    return %arg0, %c0_i32 : i32, i32
  }
  func.func @transform_1(%arg0: i32) -> (i32, i32, i32) {
    %c0_i32 = arith.constant 0 : i32
    %c0_i32_0 = arith.constant 0 : i32
    %c0_i32_1 = arith.constant 0 : i32
    %c0_i32_2 = arith.constant 0 : i32
    return %c0_i32, %c0_i32_0, %c0_i32_1 : i32, i32, i32
  }
  func.func @transform_2(%arg0: i32) -> (i32, i32) {
    %c0_i32 = arith.constant 0 : i32
    %c0_i32_0 = arith.constant 0 : i32
    %c0_i32_1 = arith.constant 0 : i32
    return %c0_i32, %c0_i32_0 : i32, i32
  }
  func.func @transform_3(%arg0: i32) -> (i32, i32) {
    %c0_i32 = arith.constant 0 : i32
    %c0_i32_0 = arith.constant 0 : i32
    %c0_i32_1 = arith.constant 0 : i32
    return %c0_i32, %c0_i32_0 : i32, i32
  }
  func.func @transform_4(%arg0: i32) -> (i32, i32) {
    %c0_i32 = arith.constant 0 : i32
    %c0_i32_0 = arith.constant 0 : i32
    return %arg0, %c0_i32 : i32, i32
  }
}

</mosaic_0001>

<bundles_post_ra>
// kernel: tpu_custom_call.1
= control target key start
LH: loop header
LB: loop body
LE: loop exit
PB: predicated region body
PF: predicated region fallthrough
CT: control target
= control target key end

     0   :  { %9 = vsyncpa [#allocation3], 0  ;;  %s1594_s0 = inlined_call_operand.vmem [shape: bf16[256,32], index: 0, kind: input, shape index: {}]   ;;  %s1595_s1 = inlined_call_operand.vmem [shape: bf16[3,32,32], index: 1, kind: input, shape index: {}]   ;;  %s1596_s2 = inlined_call_operand.vmem [shape: bf16[32,128], index: 2, kind: input, shape index: {}]   ;;  %s1597_s3 = inlined_call_operand.vmem [shape: f32[1,128], index: 3, kind: input, shape index: {}]   ;;  %s1598_s4 = inlined_call_operand.hbm [shape: f32[256,128], index: 4, kind: output, shape index: {}]  }
   0x1   :  { %11 = vsyncpa [#allocation3 + $0x1], 0  ;;  %s1411_s15 = smov 0   ;;  %s1413_s16 = smov 0  }
   0x2   :  { %s1415_s17 = smov 0   ;;  %s1417_s18 = smov 0  }
   0x3 LB: > { %s1432_s19 = sadd.s32 4294967295, %s1381_s18   ;;  %s978_s20 = sadd.s32 4294967294, %s1381_s18   ;;  %s1381_s18 = sphi %s1417_s18, %s1604_s18   ;;  %s1377_s17 = sphi %s1415_s17, %s1603_s17   ;;  %s1373_s16 = sphi %s1413_s16, %s1602_s16   ;;  %s1369_s15 = sphi %s1411_s15, %s1601_s15  }
   0x4   : > { %s1436_s21 = sadd.s32 1, %s1381_s18   ;;  %s113_s22 = sadd.s32 1, %s1377_s17 }
   0x5   : > { %s110_s23 = ssub.s32 %s1381_s18, %s1436_s21  ;;  %p123_p0 = scmp.ne.s32.totalorder %s1377_s17, %s1373_s16 }
   0x6   : > { %p111_p1 = scmp.eq.s32.totalorder %s110_s23, 0  ;;  %p124_p2 = scmp.eq.s32.totalorder %s1432_s19, 1 }
   0x7   : > { %p129_p3 = scmp.ne.s32.totalorder %s1373_s16, %s1369_s15  ;;  %p130_p4 = scmp.eq.s32.totalorder %s978_s20, 1 }
   0x8   : > { %s1447_s24 = scalar_select %p111_p1, %s1377_s17, %s113_s22  }
   0x9   : > { %p1449_p5 = por %p124_p2, %p123_p0  ;;  %p1453_p6 = por %p130_p4, %p129_p3 }
   0xa   : > { %p981_p7 = scmp.ge.s32.totalorder %s1381_s18, 1  ;;  %p166_p8 = scmp.lt.s32.totalorder %s1381_s18, 3 }
   0xc   : > { %p167_p9 = pnand %p981_p7, %p166_p8 }
   0xd   : > { %s983_s29 = sshll.u32 (!%p167_p9), %s1432_s19, 4  ;;  %s189_s5 = sand.u32 (!%p167_p9), 1, %s1373_s16  }
   0xe   : > { %170 = sbr.rel (%p167_p9) target bundleno = 915 (0x393), region = 36  ;;  %p193_p10 = scmp.lt.s32.totalorder (!%p167_p9), %s983_s29, 31 }
   0xf   : > { %s1047_s10 = sshll.u32 (!%p167_p9), %s1432_s19, 11  ;;  %s1554_s19 = scalar_lea.sflag (!%p167_p9), [#allocation3], %s189_s5 }
  0x10   : > { %s1546_s14 = scalar_lea.hbm (!%p167_p9), %s1598_s4, %s1047_s10  ;;  %s1383_s22 = smov (!%p167_p9), [#allocation2]  }
  0x11   : > { %s1325_s23 = sshll.u32 (!%p167_p9), %s1383_s22, 4  ;;  %s1326_s23 = int_to_ptr.vmem [resolvable:$false] %s1325_s23 }
  0x12   : > { %s1327_s27 = scalar_lea.vmem (!%p167_p9), %s1326_s23, 4096 }
  0x13   : > { %v1209_v0 = vld [vmem:[%s1595_s1 + $0x8] sm:$0xff]   ;;  %v1210_v1 = vld [vmem:[%s1595_s1] sm:$0xff]   ;;  %s1606_s29 = smov (!%p193_p10, %s983_s29), 31  ;;  %vm272_vm0 = vcmask 261120   ;;  %v1219_v10 = vld [vmem:[%s1595_s1 + $0x18] sm:$0xff]  }
  0x14   : > { %1088 = vmatprep.subr.bf16.mxu0 %v1209_v0  ;;  %s984_s6 = sshll.u32 %s1606_s29, 2  ;;  %1108 = vmatprep.subr.bf16.mxu1 %v1219_v10  ;;  %v1220_v11 = vld [vmem:[%s1595_s1 + $0x10] sm:$0xff]   ;;  %v1221_v12 = vld [vmem:[%s1595_s1 + $0x28] sm:$0xff]   ;;  %v1222_v53 = vld [vmem:[%s1595_s1 + $0x20] sm:$0xff]  }
  0x15   : > { %1089 = vmatpush3.bf16.msra.mxu0 %v1209_v0  ;;  %s196_s9 = scalar_lea.vmem %s1594_s0, %s984_s6  ;;  %1109 = vmatpush3.bf16.msra.mxu1 %v1219_v10  ;;  %v1223_v54 = vld [vmem:[%s1596_s2 + $0x8] sm:$0xff]   ;;  %s982_s6 = sshll.u32 %s189_s5, 7 }
  0x16   : > { %1090 = vmatprep.subr.bf16.mxu0 %v1210_v1  ;;  %v1211_v2 = vld [vmem:[%s196_s9] sm:$0xff]   ;;  %v1212_v3 = vld [vmem:[%s196_s9 + $0x8] sm:$0xff]   ;;  %v1213_v4 = vld [vmem:[%s196_s9 + $0x10] sm:$0xff]   ;;  %1110 = vmatprep.subr.bf16.mxu1 %v1220_v11 }
  0x17   : > { %1092 = vmatprep.mubr.msk.bf16.mxu0 %vm272_vm0, %v1211_v2  ;;  %v1214_v5 = vld [vmem:[%s196_s9 + $0x18] sm:$0xff]   ;;  %v1215_v6 = vld [vmem:[%s196_s9 + $0x20] sm:$0xff]   ;;  %v1216_v7 = vld [vmem:[%s196_s9 + $0x28] sm:$0xff]  }
  0x18   : > { %v1217_v8 = vld [vmem:[%s196_s9 + $0x30] sm:$0xff]   ;;  %v1218_v9 = vld [vmem:[%s196_s9 + $0x38] sm:$0xff]   ;;  %s1525_s9 = scalar_lea.vmem [#allocation2], %s982_s6 }
  0x19   : > { %1091 = vmatpush3.bf16.msra.mxu0 %v1210_v1  ;;  %1111 = vmatpush3.bf16.msra.mxu1 %v1220_v11  ;;  %s916_s11 = sshll.u32 %s1525_s9, 4  ;;  %s1548_s11 = int_to_ptr.vmem [resolvable:$true] %s916_s11 }
  0x1a   : > { %1128 = vmatprep.subr.bf16.mxu0 %v1221_v12  ;;  %1148 = vmatprep.subr.bf16.mxu1 %v1223_v54  ;;  %s1321_s20 = scalar_lea.vmem %s1548_s11, 2048  ;;  %p1328_p0 = scmp.lt.s32.totalorder %s1548_s11, %s1326_s23 }
  0x1b   : > { %p1322_p11 = scmp.ne.s32.totalorder %s1548_s11, %s1321_s20  ;;  %p1329_p1 = scmp.lt.s32.totalorder %s1327_s27, %s1321_s20 }
  0x1c   : > { %1093 = vmatmul.mubr.msk.bf16.vlgmr.msra.gmra.mxu0 %vm272_vm0, %v1212_v3 }
  0x1d   : > { %1096 = vmatprep.mubr.msk.bf16.mxu0 %vm272_vm0, %v1213_v4  ;;  %1129 = vmatpush3.bf16.msra.mxu0 %v1221_v12  ;;  %p1323_p12 = pnand %p1322_p11, %p1449_p5  ;;  %p1330_p2 = por %p1329_p1, %p1328_p0 }
  0x1e   : > { %1130 = vmatprep.subr.bf16.mxu0 %v1222_v53 }
  0x1f   : > { %p1324_p13 = pneg %p1323_p12 }
  0x21   : > { %1131 = vmatpush3.bf16.msra.mxu0 %v1222_v53  ;;  %p1331_p3 = pnand %p1330_p2, %p1324_p13 }
  0x24   : > { %1097 = vmatmul.mubr.msk.bf16.gmra.mxu0 %vm272_vm0, %v1214_v5 }
  0x25   : > { %1100 = vmatprep.mubr.msk.bf16.mxu0 %vm272_vm0, %v1215_v6 }
  0x2c   : > { %1101 = vmatmul.mubr.msk.bf16.gmra.mxu0 %vm272_vm0, %v1216_v7 }
  0x2d   : > { %1104 = vmatprep.mubr.msk.bf16.mxu0 %vm272_vm0, %v1217_v8 }
  0x34   : > { %1105 = vmatmul.mubr.msk.bf16.gmra.mxu0 %vm272_vm0, %v1218_v9 }
  0xdc   : > { %v1094_v13 = vpop.f32.mrf.mxu0 }
  0xde   : > { %v331_v14 = vpop.f32.mrf.mxu0 }
  0xdf   : > { %1225 = vtanh.f32 %v331_v14 }
  0xe0   : > { %v1095_v15 = vpop.f32.mrf.mxu0 }
  0xe1   : > { %1227 = vtanh.f32 %v1095_v15 }
  0xe2   : > { %v334_v16 = vpop.f32.mrf.mxu0 }
  0xe3   : > { %1229 = vtanh.f32 %v334_v16 }
  0xe4   : > { %1231 = vtanh.f32 %v1094_v13  ;;  %v1098_v17 = vpop.f32.mrf.mxu0 }
  0xe6   : > { %v347_v18 = vpop.f32.mrf.mxu0 }
  0xe7   : > { %1233 = vtanh.f32 %v347_v18 }
  0xe8   : > { %v1099_v19 = vpop.f32.mrf.mxu0 }
  0xe9   : > { %1235 = vtanh.f32 %v1099_v19 }
  0xea   : > { %v350_v20 = vpop.f32.mrf.mxu0 }
  0xeb   : > { %1237 = vtanh.f32 %v350_v20 }
  0xec   : > { %1239 = vtanh.f32 %v1098_v17  ;;  %v1102_v21 = vpop.f32.mrf.mxu0  ;;  %v1226_v22 = vpop.eup %1225 }
  0xee   : > { %v363_v23 = vpop.f32.mrf.mxu0  ;;  %v1228_v24 = vpop.eup %1227 }
  0xef   : > { %1241 = vtanh.f32 %v363_v23 }
  0xf0   : > { %v1230_v25 = vpop.eup %1229  ;;  %v1103_v26 = vpop.f32.mrf.mxu0 }
  0xf1   : > { %v1232_v27 = vpop.eup %1231  ;;  %v410_v28 = vpack.c.bf16 %v1230_v25, %v1226_v22  ;;  %1243 = vtanh.f32 %v1103_v26 }
  0xf2   : > { %v366_v29 = vpop.f32.mrf.mxu0  ;;  %v411_v30 = vpack.c.bf16 %v1228_v24, %v1232_v27 }
  0xf3   : > { %1245 = vtanh.f32 %v366_v29  ;;  %1112 = vmatprep.mubr.msk.bf16.mxu1 %vm272_vm0, %v410_v28 }
  0xf4   : > { %1247 = vtanh.f32 %v1102_v21  ;;  %v1106_v31 = vpop.f32.mrf.mxu0  ;;  %1113 = vmatmul.mubr.msk.bf16.vlgmr.msra.gmra.mxu1 %vm272_vm0, %v411_v30  ;;  %v1234_v32 = vpop.eup %1233 }
  0xf5   : > { %1149 = vmatpush3.bf16.msra.mxu1 %v1223_v54 }
  0xf6   : > { %v379_v33 = vpop.f32.mrf.mxu0  ;;  %v1236_v34 = vpop.eup %1235 }
  0xf7   : > { %1249 = vtanh.f32 %v379_v33 }
  0xf8   : > { %v1238_v35 = vpop.eup %1237  ;;  %v1107_v36 = vpop.f32.mrf.mxu0 }
  0xf9   : > { %v1240_v37 = vpop.eup %1239  ;;  %v412_v38 = vpack.c.bf16 %v1238_v35, %v1234_v32  ;;  %1251 = vtanh.f32 %v1107_v36 }
  0xfa   : > { %v382_v39 = vpop.f32.mrf.mxu0  ;;  %v413_v40 = vpack.c.bf16 %v1236_v34, %v1240_v37 }
  0xfb   : > { %1253 = vtanh.f32 %v382_v39  ;;  %1116 = vmatprep.mubr.msk.bf16.mxu1 %vm272_vm0, %v412_v38 }
  0xfc   : > { %1255 = vtanh.f32 %v1106_v31  ;;  %1117 = vmatmul.mubr.msk.bf16.gmra.mxu1 %vm272_vm0, %v413_v40  ;;  %v1242_v41 = vpop.eup %1241  ;;  %v1224_v31 = vld [vmem:[%s1596_s2] sm:$0xff]  }
  0xfd   : > { %1150 = vmatprep.subr.bf16.mxu1 %v1224_v31 }
  0xfe   : > { %v1244_v42 = vpop.eup %1243  ;;  %1151 = vmatpush3.bf16.msra.mxu1 %v1224_v31 }
 0x100   : > { %v1246_v43 = vpop.eup %1245 }
 0x101   : > { %v1248_v44 = vpop.eup %1247  ;;  %v414_v45 = vpack.c.bf16 %v1246_v43, %v1242_v41 }
 0x102   : > { %v415_v46 = vpack.c.bf16 %v1244_v42, %v1248_v44 }
 0x103   : > { %1120 = vmatprep.mubr.msk.bf16.mxu1 %vm272_vm0, %v414_v45 }
 0x104   : > { %1121 = vmatmul.mubr.msk.bf16.gmra.mxu1 %vm272_vm0, %v415_v46  ;;  %v1250_v47 = vpop.eup %1249 }
 0x106   : > { %v1252_v48 = vpop.eup %1251 }
 0x108   : > { %v1254_v49 = vpop.eup %1253 }
 0x109   : > { %v1256_v50 = vpop.eup %1255  ;;  %v416_v51 = vpack.c.bf16 %v1254_v49, %v1250_v47 }
 0x10a   : > { %v417_v52 = vpack.c.bf16 %v1252_v48, %v1256_v50 }
 0x10b   : > { %1124 = vmatprep.mubr.msk.bf16.mxu1 %vm272_vm0, %v416_v51 }
 0x10c   : > { %1125 = vmatmul.mubr.msk.bf16.gmra.mxu1 %vm272_vm0, %v417_v52 }
 0x1b4   : > { %v1114_v55 = vpop.f32.mrf.mxu1 }
 0x1b6   : > { %v493_v56 = vpop.f32.mrf.mxu1 }
 0x1b7   : > { %1257 = vtanh.f32 %v493_v56 }
 0x1b8   : > { %v1115_v57 = vpop.f32.mrf.mxu1 }
 0x1b9   : > { %1259 = vtanh.f32 %v1115_v57 }
 0x1ba   : > { %v496_v58 = vpop.f32.mrf.mxu1 }
 0x1bb   : > { %1261 = vtanh.f32 %v496_v58 }
 0x1bc   : > { %1263 = vtanh.f32 %v1114_v55  ;;  %v1118_v59 = vpop.f32.mrf.mxu1 }
 0x1be   : > { %v509_v60 = vpop.f32.mrf.mxu1 }
 0x1bf   : > { %1265 = vtanh.f32 %v509_v60 }
 0x1c0   : > { %v1119_v61 = vpop.f32.mrf.mxu1 }
 0x1c1   : > { %1267 = vtanh.f32 %v1119_v61 }
 0x1c2   : > { %v512_v62 = vpop.f32.mrf.mxu1 }
 0x1c3   : > { %1269 = vtanh.f32 %v512_v62 }
 0x1c4   : > { %1271 = vtanh.f32 %v1118_v59  ;;  %v1122_v63 = vpop.f32.mrf.mxu1  ;;  %v1258_v0 = vpop.eup %1257 }
 0x1c6   : > { %v525_v1 = vpop.f32.mrf.mxu1  ;;  %v1260_v2 = vpop.eup %1259 }
 0x1c7   : > { %1273 = vtanh.f32 %v525_v1 }
 0x1c8   : > { %v1262_v3 = vpop.eup %1261  ;;  %v1123_v4 = vpop.f32.mrf.mxu1 }
 0x1c9   : > { %v1264_v5 = vpop.eup %1263  ;;  %v572_v6 = vpack.c.bf16 %v1262_v3, %v1258_v0  ;;  %1275 = vtanh.f32 %v1123_v4 }
 0x1ca   : > { %v573_v7 = vpack.c.bf16 %v1260_v2, %v1264_v5  ;;  %v528_v8 = vpop.f32.mrf.mxu1 }
 0x1cb   : > { %1277 = vtanh.f32 %v528_v8  ;;  %1132 = vmatprep.mubr.msk.bf16.mxu0 %vm272_vm0, %v572_v6  ;;  %v1031_v8 = vld [vmem:[%s1597_s3] ss:$0 sm:$0xff] }
 0x1cc   : > { %1279 = vtanh.f32 %v1122_v63  ;;  %v1126_v9 = vpop.f32.mrf.mxu1  ;;  %1133 = vmatmul.mubr.msk.bf16.vlgmr.msra.gmra.mxu0 %vm272_vm0, %v573_v7  ;;  %v1266_v10 = vpop.eup %1265 }
 0x1ce   : > { %v541_v11 = vpop.f32.mrf.mxu1  ;;  %v1268_v12 = vpop.eup %1267 }
 0x1cf   : > { %1281 = vtanh.f32 %v541_v11 }
 0x1d0   : > { %v1270_v13 = vpop.eup %1269  ;;  %v1127_v14 = vpop.f32.mrf.mxu1 }
 0x1d1   : > { %v1272_v15 = vpop.eup %1271  ;;  %v574_v16 = vpack.c.bf16 %v1270_v13, %v1266_v10  ;;  %1283 = vtanh.f32 %v1127_v14 }
 0x1d2   : > { %v544_v17 = vpop.f32.mrf.mxu1  ;;  %v575_v18 = vpack.c.bf16 %v1268_v12, %v1272_v15 }
 0x1d3   : > { %1285 = vtanh.f32 %v544_v17  ;;  %1136 = vmatprep.mubr.msk.bf16.mxu0 %vm272_vm0, %v574_v16 }
 0x1d4   : > { %1287 = vtanh.f32 %v1126_v9  ;;  %1137 = vmatmul.mubr.msk.bf16.gmra.mxu0 %vm272_vm0, %v575_v18  ;;  %v1274_v19 = vpop.eup %1273 }
 0x1d6   : > { %v1276_v20 = vpop.eup %1275 }
 0x1d8   : > { %v1278_v21 = vpop.eup %1277 }
 0x1d9   : > { %v1280_v22 = vpop.eup %1279  ;;  %v576_v23 = vpack.c.bf16 %v1278_v21, %v1274_v19 }
 0x1da   : > { %v577_v24 = vpack.c.bf16 %v1276_v20, %v1280_v22 }
 0x1db   : > { %1140 = vmatprep.mubr.msk.bf16.mxu0 %vm272_vm0, %v576_v23 }
 0x1dc   : > { %1141 = vmatmul.mubr.msk.bf16.gmra.mxu0 %vm272_vm0, %v577_v24  ;;  %v1282_v25 = vpop.eup %1281 }
 0x1de   : > { %v1284_v26 = vpop.eup %1283 }
 0x1e0   : > { %v1286_v27 = vpop.eup %1285 }
 0x1e1   : > { %v1288_v28 = vpop.eup %1287  ;;  %v578_v29 = vpack.c.bf16 %v1286_v27, %v1282_v25 }
 0x1e2   : > { %v579_v30 = vpack.c.bf16 %v1284_v26, %v1288_v28 }
 0x1e3   : > { %1144 = vmatprep.mubr.msk.bf16.mxu0 %vm272_vm0, %v578_v29 }
 0x1e4   : > { %1145 = vmatmul.mubr.msk.bf16.gmra.mxu0 %vm272_vm0, %v579_v30 }
 0x28c   : > { %v1134_v32 = vpop.f32.mrf.mxu0 }
 0x28e   : > { %v655_v33 = vpop.f32.mrf.mxu0 }
 0x28f   : > { %1289 = vtanh.f32 %v655_v33 }
 0x290   : > { %v1135_v34 = vpop.f32.mrf.mxu0 }
 0x291   : > { %1291 = vtanh.f32 %v1135_v34 }
 0x292   : > { %v658_v35 = vpop.f32.mrf.mxu0 }
 0x293   : > { %1293 = vtanh.f32 %v658_v35 }
 0x294   : > { %1295 = vtanh.f32 %v1134_v32  ;;  %v1138_v36 = vpop.f32.mrf.mxu0 }
 0x296   : > { %v671_v37 = vpop.f32.mrf.mxu0 }
 0x297   : > { %1297 = vtanh.f32 %v671_v37 }
 0x298   : > { %v1139_v38 = vpop.f32.mrf.mxu0 }
 0x299   : > { %1299 = vtanh.f32 %v1139_v38 }
 0x29a   : > { %v674_v39 = vpop.f32.mrf.mxu0 }
 0x29b   : > { %1301 = vtanh.f32 %v674_v39 }
 0x29c   : > { %1303 = vtanh.f32 %v1138_v36  ;;  %v1142_v40 = vpop.f32.mrf.mxu0  ;;  %v1290_v41 = vpop.eup %1289 }
 0x29e   : > { %v687_v42 = vpop.f32.mrf.mxu0  ;;  %v1292_v43 = vpop.eup %1291 }
 0x29f   : > { %1305 = vtanh.f32 %v687_v42 }
 0x2a0   : > { %v1294_v44 = vpop.eup %1293  ;;  %v1143_v45 = vpop.f32.mrf.mxu0 }
 0x2a1   : > { %v1296_v46 = vpop.eup %1295  ;;  %v734_v47 = vpack.c.bf16 %v1294_v44, %v1290_v41  ;;  %1307 = vtanh.f32 %v1143_v45 }
 0x2a2   : > { %v735_v48 = vpack.c.bf16 %v1292_v43, %v1296_v46  ;;  %v690_v49 = vpop.f32.mrf.mxu0 }
 0x2a3   : > { %1309 = vtanh.f32 %v690_v49  ;;  %1152 = vmatprep.mubr.msk.bf16.mxu1 %vm272_vm0, %v734_v47 }
 0x2a4   : > { %1311 = vtanh.f32 %v1142_v40  ;;  %v1146_v50 = vpop.f32.mrf.mxu0  ;;  %1153 = vmatmul.mubr.msk.bf16.vlgmr.msra.gmra.mxu1 %vm272_vm0, %v735_v48  ;;  %v1298_v51 = vpop.eup %1297 }
 0x2a6   : > { %v703_v52 = vpop.f32.mrf.mxu0  ;;  %v1300_v53 = vpop.eup %1299 }
 0x2a7   : > { %1313 = vtanh.f32 %v703_v52 }
 0x2a8   : > { %v1302_v54 = vpop.eup %1301  ;;  %v1147_v55 = vpop.f32.mrf.mxu0 }
 0x2a9   : > { %v1304_v56 = vpop.eup %1303  ;;  %v736_v57 = vpack.c.bf16 %v1302_v54, %v1298_v51  ;;  %1315 = vtanh.f32 %v1147_v55 }
 0x2aa   : > { %v706_v58 = vpop.f32.mrf.mxu0  ;;  %v737_v59 = vpack.c.bf16 %v1300_v53, %v1304_v56 }
 0x2ab   : > { %1317 = vtanh.f32 %v706_v58  ;;  %1156 = vmatprep.mubr.msk.bf16.mxu1 %vm272_vm0, %v736_v57 }
 0x2ac   : > { %1319 = vtanh.f32 %v1146_v50  ;;  %1157 = vmatmul.mubr.msk.bf16.gmra.mxu1 %vm272_vm0, %v737_v59  ;;  %v1306_v60 = vpop.eup %1305 }
 0x2ae   : > { %v1308_v61 = vpop.eup %1307 }
 0x2b0   : > { %v1310_v62 = vpop.eup %1309 }
 0x2b1   : > { %v1312_v63 = vpop.eup %1311  ;;  %v738_v0 = vpack.c.bf16 %v1310_v62, %v1306_v60 }
 0x2b2   : > { %v739_v1 = vpack.c.bf16 %v1308_v61, %v1312_v63 }
 0x2b3   : > { %1160 = vmatprep.mubr.msk.bf16.mxu1 %vm272_vm0, %v738_v0 }
 0x2b4   : > { %1161 = vmatmul.mubr.msk.bf16.gmra.mxu1 %vm272_vm0, %v739_v1  ;;  %v1314_v2 = vpop.eup %1313 }
 0x2b6   : > { %v1316_v3 = vpop.eup %1315 }
 0x2b8   : > { %v1318_v4 = vpop.eup %1317 }
 0x2b9   : > { %v1320_v5 = vpop.eup %1319  ;;  %v740_v6 = vpack.c.bf16 %v1318_v4, %v1314_v2 }
 0x2ba   : > { %v741_v7 = vpack.c.bf16 %v1316_v3, %v1320_v5 }
 0x2bb   : > { %1164 = vmatprep.mubr.msk.bf16.mxu1 %vm272_vm0, %v740_v6 }
 0x2bc   : > { %1165 = vmatmul.mubr.msk.bf16.gmra.mxu1 %vm272_vm0, %v741_v7 }
 0x364   : > { %v1154_v9 = vpop.f32.mrf.mxu1 }
 0x365   : > { %v832_v10 = vadd.f32 %v1154_v9, %v1031_v8 }
 0x366   : > { %v823_v11 = vpop.f32.mrf.mxu1 }
 0x367   : > { %888 = vst [vmem:[%s1525_s9 + $0x10] sm:$0xff] %v832_v10  ;;  %v824_v12 = vadd.f32 %v1031_v8, %v823_v11 }
 0x368   : > { %v1155_v13 = vpop.f32.mrf.mxu1 }
 0x369   : > { %886 = vst [vmem:[%s1525_s9] sm:$0xff] %v824_v12  ;;  %v835_v14 = vadd.f32 %v1155_v13, %v1031_v8 }
 0x36a   : > { %v826_v15 = vpop.f32.mrf.mxu1 }
 0x36b   : > { %889 = vst [vmem:[%s1525_s9 + $0x18] sm:$0xff] %v835_v14  ;;  %v827_v16 = vadd.f32 %v1031_v8, %v826_v15 }
 0x36c   : > { %v1158_v17 = vpop.f32.mrf.mxu1 }
 0x36d   : > { %887 = vst [vmem:[%s1525_s9 + $0x8] sm:$0xff] %v827_v16  ;;  %v848_v18 = vadd.f32 %v1158_v17, %v1031_v8 }
 0x36e   : > { %v839_v19 = vpop.f32.mrf.mxu1 }
 0x36f   : > { %892 = vst [vmem:[%s1525_s9 + $0x30] sm:$0xff] %v848_v18  ;;  %v840_v20 = vadd.f32 %v1031_v8, %v839_v19 }
 0x370   : > { %v1159_v21 = vpop.f32.mrf.mxu1 }
 0x371   : > { %890 = vst [vmem:[%s1525_s9 + $0x20] sm:$0xff] %v840_v20  ;;  %v851_v22 = vadd.f32 %v1159_v21, %v1031_v8 }
 0x372   : > { %v842_v23 = vpop.f32.mrf.mxu1 }
 0x373   : > { %893 = vst [vmem:[%s1525_s9 + $0x38] sm:$0xff] %v851_v22  ;;  %v843_v24 = vadd.f32 %v1031_v8, %v842_v23 }
 0x374   : > { %v1162_v25 = vpop.f32.mrf.mxu1 }
 0x375   : > { %891 = vst [vmem:[%s1525_s9 + $0x28] sm:$0xff] %v843_v24  ;;  %v864_v26 = vadd.f32 %v1162_v25, %v1031_v8 }
 0x376   : > { %v855_v27 = vpop.f32.mrf.mxu1 }
 0x377   : > { %896 = vst [vmem:[%s1525_s9 + $0x50] sm:$0xff] %v864_v26  ;;  %v856_v28 = vadd.f32 %v1031_v8, %v855_v27 }
 0x378   : > { %v1163_v29 = vpop.f32.mrf.mxu1 }
 0x379   : > { %894 = vst [vmem:[%s1525_s9 + $0x40] sm:$0xff] %v856_v28  ;;  %v867_v30 = vadd.f32 %v1163_v29, %v1031_v8 }
 0x37a   : > { %v858_v31 = vpop.f32.mrf.mxu1 }
 0x37b   : > { %897 = vst [vmem:[%s1525_s9 + $0x58] sm:$0xff] %v867_v30  ;;  %v859_v32 = vadd.f32 %v1031_v8, %v858_v31 }
 0x37c   : > { %v1166_v33 = vpop.f32.mrf.mxu1 }
 0x37d   : > { %895 = vst [vmem:[%s1525_s9 + $0x48] sm:$0xff] %v859_v32  ;;  %v880_v34 = vadd.f32 %v1166_v33, %v1031_v8 }
 0x37e   : > { %v871_v35 = vpop.f32.mrf.mxu1 }
 0x37f   : > { %900 = vst [vmem:[%s1525_s9 + $0x70] sm:$0xff] %v880_v34  ;;  %v872_v36 = vadd.f32 %v1031_v8, %v871_v35 }
 0x380   : > { %v1167_v37 = vpop.f32.mrf.mxu1 }
 0x381   : > { %898 = vst [vmem:[%s1525_s9 + $0x60] sm:$0xff] %v872_v36  ;;  %v883_v38 = vadd.f32 %v1167_v37, %v1031_v8 }
 0x382   : > { %v874_v39 = vpop.f32.mrf.mxu1 }
 0x383   : > { %901 = vst [vmem:[%s1525_s9 + $0x78] sm:$0xff] %v883_v38  ;;  %v875_v40 = vadd.f32 %v1031_v8, %v874_v39 }
 0x385   : > { %899 = vst [vmem:[%s1525_s9 + $0x68] sm:$0xff] %v875_v40 }
 0x386   : > { %1334 = shalt.err (!%p1331_p3)
}
 0x387   : > { %s1335_s28 = scalar_lea.hbm %s1546_s14, 2048  ;;  %s1339_s5 = scalar_lea.hbm %s1598_s4, 4096 }
 0x388   : > { %p1336_p4 = scmp.ne.s32.totalorder %s1546_s14, %s1335_s28  ;;  %p1340_p9 = scmp.lt.s32.totalorder %s1546_s14, %s1598_s4 }
 0x389   : > { %p1341_p10 = scmp.lt.s32.totalorder %s1339_s5, %s1335_s28 }
 0x38a   : > { %p1337_p7 = pnand %p1336_p4, %p1449_p5 }
 0x38b   : > { %p1342_p11 = por %p1341_p10, %p1340_p9 }
 0x38c   : > { %p1338_p8 = pneg %p1337_p7 }
 0x38e   : > { %p1343_p12 = pnand %p1342_p11, %p1338_p8 }
 0x390   : > { %1346 = shalt.err (!%p1343_p12)
}
 0x391   : > { %s1384_s8 = smov 128   ;;  %s1385_s9 = smov 8  }
 0x392   : > { %1168 = dma.vmem_to_hbm [thread:$0]  (%p1449_p5), %s1548_s11, 2048, %s1546_s14, %s1554_s19, %s1384_s8, %s1384_s8, %s1385_s9  }
 0x393 PF: > { %p1174_p13 = scmp.ge.s32.totalorder %s1381_s18, 2  ;;  %s931_s10 = sand.u32 1, %s1369_s15  }
 0x394   : > { %s932_s12 = scalar_lea.sflag [#allocation3], %s931_s10 }
 0x395   : > { %p1171_p0 = pnand %p1174_p13, %p1453_p6 }
 0x397   : > { %p1172_p1 = pneg %p1171_p0 }
 0x399   : > { %1364 = dma.done.wait (%p1172_p1), %s932_s12, 2048  }
 0x39a   : > { %1366 = vsyncadd (%p1172_p1), %s932_s12, 4294965248  ;;  %p14_p2 = scmp.ge.s32.totalorder %s1436_s21, 4   ;;  %s1601_s15 = smov %s1373_s16 }
 0x39b   : > { %s1602_s16 = smov %s1377_s17  ;;  %s1603_s17 = smov %s1447_s24 }
 0x39c   : > { %s1604_s18 = smov %s1436_s21  ;;  %16 = sbr.rel (!%p14_p2) target bundleno = 3 (0x3), region = 73 }
 0x3a1   :  { %937 = vsyncpa [#allocation3], 1 }
 0x3a2   :  { %939 = vsyncpa [#allocation3 + $0x1], 1 }

</bundles_post_ra>
